<compile_context>
chip_gen: v5e
topology: v5e:2x2
jax: 0.10.0
libtpu: 0.0.40
codegen_flags: <defaults>
</compile_context>

<pallas_src>
import jax
import jax.numpy as jnp
from jax.experimental import pallas as pl
from jax.experimental.pallas import tpu as pltpu


def _round_up(x, m):
    return (x + m - 1) // m * m


def critic_kernel(x_ref, w1_ref, b1_ref, w2_ref, b2_ref, w3_ref, b3_ref, o_ref):
    # ---- fc1 (+ReLU): one K=Kp bf16 MXU dot (concat fused into x), f32 acc ----
    x = x_ref[...].astype(jnp.bfloat16)
    h1 = jnp.dot(x, w1_ref[...], preferred_element_type=jnp.float32)
    h1 = jnp.maximum(h1 + b1_ref[...], 0.0)

    # ---- fc2 (+ReLU): bf16 operands, f32 accumulation ----
    h2 = jnp.dot(h1.astype(jnp.bfloat16), w2_ref[...],
                 preferred_element_type=jnp.float32)
    h2 = jnp.maximum(h2 + b2_ref[...], 0.0)

    # ---- fc3: MXU dot against (H2, 128) zero-padded w3 column block ----
    # Produces a lane-dense (TB, 128) slab; only column 0 is meaningful
    # (sliced in the wrapper).  Keeps stores unmasked / lane-dense.
    out = jnp.dot(h2.astype(jnp.bfloat16), w3_ref[...],
                  preferred_element_type=jnp.float32)
    o_ref[...] = (out + b3_ref[0]).astype(o_ref.dtype)


def critic_forward(state, goal, action, params, *, block_b=512):
    """state: (B, S), goal: (B, G), action: (B, A) -> (B, 1) float32."""
    w1p, b1, w2, b2, w3p, b3 = params
    B = state.shape[0]
    in_dim = state.shape[1] + goal.shape[1] + action.shape[1]
    Kp, H1 = w1p.shape
    H2 = w2.shape[1]
    N_OUT = w3p.shape[1]                      # lane-dense (128-wide) output slab

    # Batch tiling: TB is a multiple of 16 (bf16 sublane pack) chosen to nearly
    # divide B, so the ragged last tile never pads a whole extra block.
    num_tiles = max(1, -(-B // block_b))
    TB = _round_up(-(-B // num_tiles), 16)
    Bp = TB * num_tiles

    # Fused concat + K-pad: one (Bp, Kp) zero-padded slab -> fc1 is a single dot.
    x = jnp.concatenate([state, goal, action], axis=1)
    x = jnp.pad(x, ((0, Bp - B), (0, Kp - in_dim)))

    resident = lambda shape: pl.BlockSpec(shape, lambda i: (0, 0))

    out = pl.pallas_call(
        critic_kernel,
        out_shape=jax.ShapeDtypeStruct((Bp, N_OUT), jnp.float32),
        grid=(Bp // TB,),
        in_specs=[
            pl.BlockSpec((TB, Kp), lambda i: (i, 0)),            # activation slab
            resident((Kp, H1)),                                  # w1 (K-padded)
            resident((1, H1)),                                   # b1
            resident((H1, H2)),                                  # w2
            resident((1, H2)),                                   # b2
            resident((H2, N_OUT)),                               # w3 column block
            pl.BlockSpec(memory_space=pltpu.MemorySpace.SMEM),   # b3 scalar
        ],
        out_specs=pl.BlockSpec((TB, N_OUT), lambda i: (i, 0)),
        compiler_params=pltpu.CompilerParams(
            dimension_semantics=("parallel",)),
    )(x, w1p, b1, w2, b2, w3p, b3)

    return out[:B, :1]


def init_params(key, state_dim, goal_dim, action_dim, hidden=256, k_align=64):
    """Deterministic synthetic init mimicking nn.Linear shapes.

    fc1/fc2 weights are stored (in_features, out_features) so the kernel does
    x @ W.  fc1's weight is zero-padded along K to a multiple of `k_align` so
    the fused-concat slab feeds one MXU dot; fc3's weight is a (hidden, 128)
    zero-padded column block so the output is lane-dense.  Matmul weights are
    bf16 (native MXU dtype); biases stay f32.
    """
    in_dim = state_dim + goal_dim + action_dim
    Kp = _round_up(in_dim, k_align)
    ks = jax.random.split(key, 6)

    def uniform(k, shape, fan_in):
        bound = 1.0 / jnp.sqrt(fan_in)
        return jax.random.uniform(k, shape, jnp.float32, -bound, bound)

    w1 = uniform(ks[0], (in_dim, hidden), in_dim)
    b1 = uniform(ks[1], (1, hidden), in_dim)
    w2 = uniform(ks[2], (hidden, hidden), hidden)
    b2 = uniform(ks[3], (1, hidden), hidden)
    w3 = uniform(ks[4], (hidden,), hidden)
    b3 = uniform(ks[5], (1,), hidden)

    w1p = jnp.zeros((Kp, hidden), jnp.float32).at[:in_dim].set(w1)
    w3p = jnp.zeros((hidden, 128), jnp.float32).at[:, 0].set(w3)

    return (w1p.astype(jnp.bfloat16), b1,
            w2.astype(jnp.bfloat16), b2,
            w3p.astype(jnp.bfloat16), b3)


def reference_forward(state, goal, action, params):
    """Pure-JAX reference with the same bf16 rounding points as the kernel."""
    w1p, b1, w2, b2, w3p, b3 = params
    f32 = jnp.float32
    bf = lambda t: t.astype(jnp.bfloat16).astype(f32)
    hp = jax.lax.Precision.HIGHEST
    in_dim = state.shape[1] + goal.shape[1] + action.shape[1]
    x = bf(jnp.concatenate([state, goal, action], axis=1))
    h1 = jnp.maximum(jnp.dot(x, w1p[:in_dim].astype(f32), precision=hp) + b1, 0.0)
    h2 = jnp.maximum(jnp.dot(bf(h1), w2.astype(f32), precision=hp) + b2, 0.0)
    return jnp.dot(bf(h2), w3p.astype(f32), precision=hp)[:, :1] + b3


if __name__ == "__main__":
    # Small, MuJoCo-plausible dims: state_dim = nq + nv, goal_dim = 3, action_dim = nu.
    batch = 8
    state_dim = 32
    goal_dim = 3
    action_dim = 8

    key = jax.random.PRNGKey(0)
    k_params, k_s, k_g, k_a = jax.random.split(key, 4)

    params = init_params(k_params, state_dim, goal_dim, action_dim)

    state = jax.random.normal(k_s, (batch, state_dim), jnp.float32)
    goal = jax.random.normal(k_g, (batch, goal_dim), jnp.float32)
    action = jax.random.normal(k_a, (batch, action_dim), jnp.float32)

    out = critic_forward(state, goal, action, params)
    out = jax.block_until_ready(out)

    ref = reference_forward(state, goal, action, params)
    assert out.shape == (batch, 1), out.shape
    max_err = jnp.max(jnp.abs(out - ref))
    assert jnp.allclose(out, ref, atol=1e-3, rtol=1e-3), (
        f"mismatch vs reference, max abs err = {max_err}")

    print("KERNEL_OK")
</pallas_src>

<mosaic_0001>
module attributes {stable_mosaic.version = 11 : i64} {
  func.func @critic_kernel(%arg0: i32, %arg1: memref<16x64xf32, #tpu.memory_space<vmem>>, %arg2: memref<64x256xbf16, #tpu.memory_space<vmem>>, %arg3: memref<1x256xf32, #tpu.memory_space<vmem>>, %arg4: memref<256x256xbf16, #tpu.memory_space<vmem>>, %arg5: memref<1x256xf32, #tpu.memory_space<vmem>>, %arg6: memref<256x128xbf16, #tpu.memory_space<vmem>>, %arg7: memref<1xf32, #tpu.memory_space<smem>>, %arg8: memref<16x128xf32, #tpu.memory_space<vmem>>) attributes {dimension_semantics = [#tpu.dimension_semantics<parallel>], iteration_bounds = array<i64: 1>, scalar_prefetch = 0 : i64, scratch_operands = 0 : i64, tpu.core_type = #tpu.core_type<tc>, window_params = [{transform_indices = @transform_0, window_bounds = array<i64: 16, 64>}, {pipeline_mode = #tpu.pipeline_mode<synchronous>, transform_indices = @transform_1, window_bounds = array<i64: 64, 256>}, {pipeline_mode = #tpu.pipeline_mode<synchronous>, transform_indices = @transform_2, window_bounds = array<i64: 1, 256>}, {pipeline_mode = #tpu.pipeline_mode<synchronous>, transform_indices = @transform_3, window_bounds = array<i64: 256, 256>}, {pipeline_mode = #tpu.pipeline_mode<synchronous>, transform_indices = @transform_4, window_bounds = array<i64: 1, 256>}, {pipeline_mode = #tpu.pipeline_mode<synchronous>, transform_indices = @transform_5, window_bounds = array<i64: 256, 128>}, {transform_indices = @transform_6, window_bounds = array<i64: 1>}, {transform_indices = @transform_7, window_bounds = array<i64: 16, 128>}]} {
    %c0 = arith.constant 0 : index
    %c0_0 = arith.constant 0 : index
    %0 = vector.load %arg1[%c0, %c0_0] : memref<16x64xf32, #tpu.memory_space<vmem>>, vector<16x64xf32>
    %1 = arith.truncf %0 : vector<16x64xf32> to vector<16x64xbf16>
    %c0_1 = arith.constant 0 : index
    %c0_2 = arith.constant 0 : index
    %2 = vector.load %arg2[%c0_1, %c0_2] : memref<64x256xbf16, #tpu.memory_space<vmem>>, vector<64x256xbf16>
    %cst = arith.constant dense<0.000000e+00> : vector<16x256xf32>
    %3 = tpu.matmul %1, %2, %cst {dimension_numbers = #tpu.dot_dimension_numbers<[1], [0], [0], [1], [0, 0, 1, 1], [], []>} : vector<16x64xbf16>, vector<64x256xbf16>, vector<16x256xf32> -> vector<16x256xf32>
    %c0_3 = arith.constant 0 : index
    %c0_4 = arith.constant 0 : index
    %4 = vector.load %arg3[%c0_3, %c0_4] : memref<1x256xf32, #tpu.memory_space<vmem>>, vector<1x256xf32>
    %5 = vector.broadcast %4 : vector<1x256xf32> to vector<16x256xf32>
    %6 = arith.addf %3, %5 : vector<16x256xf32>
    %cst_5 = arith.constant 0.000000e+00 : f32
    %7 = vector.broadcast %cst_5 : f32 to vector<16x256xf32>
    %8 = arith.maximumf %6, %7 : vector<16x256xf32>
    %9 = arith.truncf %8 : vector<16x256xf32> to vector<16x256xbf16>
    %c0_6 = arith.constant 0 : index
    %c0_7 = arith.constant 0 : index
    %10 = vector.load %arg4[%c0_6, %c0_7] : memref<256x256xbf16, #tpu.memory_space<vmem>>, vector<256x256xbf16>
    %cst_8 = arith.constant dense<0.000000e+00> : vector<16x256xf32>
    %11 = tpu.matmul %9, %10, %cst_8 {dimension_numbers = #tpu.dot_dimension_numbers<[1], [0], [0], [1], [0, 0, 1, 1], [], []>} : vector<16x256xbf16>, vector<256x256xbf16>, vector<16x256xf32> -> vector<16x256xf32>
    %c0_9 = arith.constant 0 : index
    %c0_10 = arith.constant 0 : index
    %12 = vector.load %arg5[%c0_9, %c0_10] : memref<1x256xf32, #tpu.memory_space<vmem>>, vector<1x256xf32>
    %13 = vector.broadcast %12 : vector<1x256xf32> to vector<16x256xf32>
    %14 = arith.addf %11, %13 : vector<16x256xf32>
    %cst_11 = arith.constant 0.000000e+00 : f32
    %15 = vector.broadcast %cst_11 : f32 to vector<16x256xf32>
    %16 = arith.maximumf %14, %15 : vector<16x256xf32>
    %17 = arith.truncf %16 : vector<16x256xf32> to vector<16x256xbf16>
    %c0_12 = arith.constant 0 : index
    %c0_13 = arith.constant 0 : index
    %18 = vector.load %arg6[%c0_12, %c0_13] : memref<256x128xbf16, #tpu.memory_space<vmem>>, vector<256x128xbf16>
    %cst_14 = arith.constant dense<0.000000e+00> : vector<16x128xf32>
    %19 = tpu.matmul %17, %18, %cst_14 {dimension_numbers = #tpu.dot_dimension_numbers<[1], [0], [0], [1], [0, 0, 1, 1], [], []>} : vector<16x256xbf16>, vector<256x128xbf16>, vector<16x128xf32> -> vector<16x128xf32>
    %c0_15 = arith.constant 0 : index
    %20 = memref.load %arg7[%c0_15] : memref<1xf32, #tpu.memory_space<smem>>
    %21 = vector.broadcast %20 : f32 to vector<16x128xf32>
    %22 = arith.addf %19, %21 : vector<16x128xf32>
    %c0_16 = arith.constant 0 : index
    %c0_17 = arith.constant 0 : index
    %23 = vector.load %arg8[%c0_16, %c0_17] : memref<16x128xf32, #tpu.memory_space<vmem>>, vector<16x128xf32>
    tpu.vector_store %arg8[%c0_16, %c0_17], %22 {strides = array<i32>} : memref<16x128xf32, #tpu.memory_space<vmem>>, vector<16x128xf32>,
    return
  }
  func.func @transform_0(%arg0: i32) -> (i32, i32) {
    %c0_i32 = arith.constant 0 : i32
    %c0_i32_0 = arith.constant 0 : i32
    return %arg0, %c0_i32 : i32, i32
  }
  func.func @transform_1(%arg0: i32) -> (i32, i32) {
    %c0_i32 = arith.constant 0 : i32
    %c0_i32_0 = arith.constant 0 : i32
    %c0_i32_1 = arith.constant 0 : i32
    return %c0_i32, %c0_i32_0 : i32, i32
  }
  func.func @transform_2(%arg0: i32) -> (i32, i32) {
    %c0_i32 = arith.constant 0 : i32
    %c0_i32_0 = arith.constant 0 : i32
    %c0_i32_1 = arith.constant 0 : i32
    return %c0_i32, %c0_i32_0 : i32, i32
  }
  func.func @transform_3(%arg0: i32) -> (i32, i32) {
    %c0_i32 = arith.constant 0 : i32
    %c0_i32_0 = arith.constant 0 : i32
    %c0_i32_1 = arith.constant 0 : i32
    return %c0_i32, %c0_i32_0 : i32, i32
  }
  func.func @transform_4(%arg0: i32) -> (i32, i32) {
    %c0_i32 = arith.constant 0 : i32
    %c0_i32_0 = arith.constant 0 : i32
    %c0_i32_1 = arith.constant 0 : i32
    return %c0_i32, %c0_i32_0 : i32, i32
  }
  func.func @transform_5(%arg0: i32) -> (i32, i32) {
    %c0_i32 = arith.constant 0 : i32
    %c0_i32_0 = arith.constant 0 : i32
    %c0_i32_1 = arith.constant 0 : i32
    return %c0_i32, %c0_i32_0 : i32, i32
  }
  func.func @transform_6(%arg0: i32) -> i32 {
    %c0_i32 = arith.constant 0 : i32
    %c0_i32_0 = arith.constant 0 : i32
    return %c0_i32 : i32
  }
  func.func @transform_7(%arg0: i32) -> (i32, i32) {
    %c0_i32 = arith.constant 0 : i32
    %c0_i32_0 = arith.constant 0 : i32
    return %arg0, %c0_i32 : i32, i32
  }
}

</mosaic_0001>

<bundles_post_ra>
// kernel: tpu_custom_call.1
= control target key start
LH: loop header
LB: loop body
LE: loop exit
PB: predicated region body
PF: predicated region fallthrough
CT: control target
= control target key end

     0   :  { %13 = vsyncpa [#allocation4], 0  ;;  %s1134_s0 = inlined_call_operand.hbm [shape: f32[16,64], index: 0, kind: input, shape index: {}]   ;;  %s1135_s1 = inlined_call_operand.hbm [shape: bf16[64,256], index: 1, kind: input, shape index: {}]   ;;  %s1136_s2 = inlined_call_operand.vmem [shape: f32[1,256], index: 2, kind: input, shape index: {}]   ;;  %s1137_s3 = inlined_call_operand.hbm [shape: bf16[256,256], index: 3, kind: input, shape index: {}]   ;;  %s1138_s4 = inlined_call_operand.vmem [shape: f32[1,256], index: 4, kind: input, shape index: {}]   ;;  %s1139_s5 = inlined_call_operand.hbm [shape: bf16[256,128], index: 5, kind: input, shape index: {}]   ;;  %s1140_s6 = inlined_call_operand.<no memory space> [shape: f32[1], index: 6, kind: input, shape index: {}]   ;;  %s1141_s7 = inlined_call_operand.hbm [shape: f32[16,128], index: 7, kind: output, shape index: {}]  }
   0x1   :  { %14 = vsyncpa [#allocation7], 0 }
   0x2   :  { %15 = vsyncpa [#allocation10], 0 }
   0x3   :  { %16 = vsyncpa [#allocation5], 0  ;;  %s34_s26 = sshll.u32 %s1135_s1, 4  ;;  %s1047_s27 = smov [#allocation6]   ;;  %s35_s26 = int_to_ptr.hbm [resolvable:$true] %s34_s26 }
   0x4   :  { %s36_s28 = sshll.u32 %s1047_s27, 4  ;;  %s21_s8 = sshll.u32 %s1134_s0, 4  ;;  %s37_s28 = int_to_ptr.vmem [resolvable:$true] %s36_s28  ;;  %s22_s8 = int_to_ptr.hbm [resolvable:$true] %s21_s8 }
   0x5   :  { %s1048_s9 = smov 128   ;;  %s1049_s10 = smov 8  }
   0x6   :  { %42 = dma.hbm_to_vmem [thread:$0]  %s35_s26, 1024, %s37_s28, [#allocation7], %s1048_s9, %s1048_s9, %s1049_s10  }
   0x7   :  { %s1050_s11 = smov [#allocation3]   ;;  %s49_s1 = sshll.u32 %s1137_s3, 4  ;;  %s50_s1 = int_to_ptr.hbm [resolvable:$true] %s49_s1 }
   0x8   :  { %s23_s12 = sshll.u32 %s1050_s11, 4  ;;  %s64_s16 = sshll.u32 %s1139_s5, 4  ;;  %s24_s12 = int_to_ptr.vmem [resolvable:$true] %s23_s12  ;;  %s65_s16 = int_to_ptr.hbm [resolvable:$true] %s64_s16 }
   0x9   :  { %29 = dma.hbm_to_vmem [thread:$0]  %s22_s8, 256, %s24_s12, [#allocation4], %s1048_s9, %s1048_s9, %s1049_s10  }
   0xa   :  { %s1051_s17 = smov [#allocation8]   ;;  %s1052_s19 = smov [#allocation9]  }
   0xb   :  { %s51_s18 = sshll.u32 %s1051_s17, 4  ;;  %s66_s3 = sshll.u32 %s1052_s19, 4  ;;  %s52_s18 = int_to_ptr.vmem [resolvable:$true] %s51_s18  ;;  %s67_s3 = int_to_ptr.vmem [resolvable:$true] %s66_s3 }
   0xc   :  { %57 = dma.hbm_to_vmem [thread:$0]  %s50_s1, 4096, %s52_s18, [#allocation7], %s1048_s9, %s1048_s9, %s1049_s10  }
   0xd   :  { %s1053_s20 = smov 64   ;;  %s1054_s21 = smov 4  }
   0xe   :  { %72 = dma.hbm_to_vmem [thread:$0]  %s65_s16, 2048, %s67_s3, [#allocation10], %s1053_s20, %s1053_s20, %s1054_s21  }
   0xf   :  { %1039 = dma.done.wait [#allocation4], 256  }
  0x10   :  { %1040 = vsyncadd [#allocation4], 4294967040 }
  0x11   :  { %1041 = dma.done.wait [#allocation7], 5120  }
  0x12   :  { %1042 = vsyncadd [#allocation7], 4294962176 }
  0x13   :  { %1043 = dma.done.wait [#allocation10], 2048  }
  0x14   :  { %1044 = vsyncadd [#allocation10], 4294965248  ;;  %v654_v0 = vld [vmem:[#allocation6 + $0x30] sm:$0xf]  ;;  %v861_v1 = vld [vmem:[#allocation6 + $0x34] sm:$0xf0] }
  0x15   :  { %v860_v2 = vld [vmem:[#allocation6 + $0x34] sm:$0xf]  ;;  %v655_v3 = vor.u32 %v861_v1, %v654_v0  ;;  %v656_v4 = vld [vmem:[#allocation6 + $0x38] sm:$0xf0]  ;;  %v646_v5 = vld [vmem:[#allocation6 + $0x20] sm:$0xf] }
  0x16   :  { %v859_v6 = vld [vmem:[#allocation6 + $0x24] sm:$0xf0]  ;;  %v659_v7 = vor.u32 %v860_v2, %v656_v4  ;;  %v858_v8 = vld [vmem:[#allocation6 + $0x24] sm:$0xf]  ;;  %v648_v9 = vld [vmem:[#allocation6 + $0x28] sm:$0xf0] }
  0x17   :  { %157 = vmatpush.bf16.msra.mxu0 %v655_v3  ;;  %v647_v10 = vor.u32 %v859_v6, %v646_v5  ;;  %v651_v11 = vor.u32 %v858_v8, %v648_v9  ;;  %v638_v12 = vld [vmem:[#allocation6 + $0x10] sm:$0xf]  ;;  %v857_v13 = vld [vmem:[#allocation6 + $0x14] sm:$0xf0]  ;;  %v856_v14 = vld [vmem:[#allocation6 + $0x14] sm:$0xf] }
  0x18   :  { %171 = vmatpush.bf16.msra.mxu1 %v659_v7  ;;  %v640_v15 = vld [vmem:[#allocation6 + $0x18] sm:$0xf0]  ;;  %v630_v16 = vld [vmem:[#allocation6] sm:$0xf]  ;;  %v855_v17 = vld [vmem:[#allocation6 + $0x4] sm:$0xf0]  ;;  %v639_v21 = vor.u32 %v857_v13, %v638_v12 }
  0x19   :  { %v720_v18 = vld [vmem:[#allocation8 + $0x70] sm:$0xf]  ;;  %v877_v19 = vld [vmem:[#allocation8 + $0x74] sm:$0xf0]  ;;  %v854_v22 = vld [vmem:[#allocation6 + $0x4] sm:$0xf]  ;;  %v643_v26 = vor.u32 %v856_v14, %v640_v15  ;;  %v631_v39 = vor.u32 %v855_v17, %v630_v16 }
  0x1a   :  { %v784_v20 = vld [vmem:[#allocation8 + $0xf0] sm:$0xf]  ;;  %v632_v23 = vld [vmem:[#allocation6 + $0x8] sm:$0xf0]  ;;  %v721_v24 = vor.u32 %v877_v19, %v720_v18  ;;  %v893_v25 = vld [vmem:[#allocation8 + $0xf4] sm:$0xf0] }
  0x1b   :  { %158 = vmatpush.bf16.msra.mxu0 %v647_v10  ;;  %v785_v27 = vor.u32 %v893_v25, %v784_v20  ;;  %v876_v28 = vld [vmem:[#allocation8 + $0x74] sm:$0xf]  ;;  %v722_v29 = vld [vmem:[#allocation8 + $0x78] sm:$0xf0]  ;;  %v712_v30 = vld [vmem:[#allocation8 + $0x60] sm:$0xf]  ;;  %v635_v43 = vor.u32 %v854_v22, %v632_v23 }
  0x1c   :  { %172 = vmatpush.bf16.msra.mxu1 %v651_v11  ;;  %385 = vmatpush.bf16.msra.mxu2 %v721_v24  ;;  %v875_v31 = vld [vmem:[#allocation8 + $0x64] sm:$0xf0]  ;;  %v776_v32 = vld [vmem:[#allocation8 + $0xe0] sm:$0xf]  ;;  %v92_v34 = vld [vmem:[#allocation3] sm:$0xff]  ;;  %v725_v44 = vor.u32 %v876_v28, %v722_v29  ;;  %vm149_vm0 = vcmask 523264  }
  0x1d   :  { %v891_v33 = vld [vmem:[#allocation8 + $0xe4] sm:$0xf0]  ;;  %399 = vmatpush.bf16.msra.mxu3 %v785_v27  ;;  %v892_v35 = vld [vmem:[#allocation8 + $0xf4] sm:$0xf]  ;;  %v786_v36 = vld [vmem:[#allocation8 + $0xf8] sm:$0xf0]  ;;  %v713_v37 = vor.u32 %v875_v31, %v712_v30 }
  0x1e   :  { %v777_v38 = vor.u32 %v891_v33, %v776_v32  ;;  %v93_v40 = vld [vmem:[#allocation3 + $0x8] sm:$0xff]  ;;  %v704_v41 = vld [vmem:[#allocation8 + $0x50] sm:$0xf]  ;;  %v789_v47 = vor.u32 %v892_v35, %v786_v36  ;;  %v874_v48 = vld [vmem:[#allocation8 + $0x64] sm:$0xf]  ;;  %s1055_s25 = smov [#allocation11]  }
  0x1f   :  { %159 = vmatpush.bf16.msra.mxu0 %v639_v21  ;;  %v873_v42 = vld [vmem:[#allocation8 + $0x54] sm:$0xf0]  ;;  %v768_v45 = vld [vmem:[#allocation8 + $0xd0] sm:$0xf]  ;;  %v714_v49 = vld [vmem:[#allocation8 + $0x68] sm:$0xf0]  ;;  %v94_v52 = vpack.c.bf16 %v93_v40, %v92_v34 }
  0x20   :  { %173 = vmatpush.bf16.msra.mxu1 %v643_v26  ;;  %v889_v46 = vld [vmem:[#allocation8 + $0xd4] sm:$0xf0]  ;;  %386 = vmatpush.bf16.msra.mxu2 %v713_v37  ;;  %v890_v50 = vld [vmem:[#allocation8 + $0xe4] sm:$0xf]  ;;  %v705_v51 = vor.u32 %v873_v42, %v704_v41  ;;  %v778_v53 = vld [vmem:[#allocation8 + $0xe8] sm:$0xf0]  ;;  %v717_v59 = vor.u32 %v874_v48, %v714_v49 }
  0x21   :  { %400 = vmatpush.bf16.msra.mxu3 %v777_v38  ;;  %v769_v54 = vor.u32 %v889_v46, %v768_v45  ;;  %v696_v55 = vld [vmem:[#allocation8 + $0x40] sm:$0xf]  ;;  %v871_v56 = vld [vmem:[#allocation8 + $0x44] sm:$0xf0]  ;;  %v781_v60 = vor.u32 %v890_v50, %v778_v53  ;;  %v872_v61 = vld [vmem:[#allocation8 + $0x54] sm:$0xf] }
  0x22   :  { %v760_v57 = vld [vmem:[#allocation8 + $0xc0] sm:$0xf]  ;;  %v887_v58 = vld [vmem:[#allocation8 + $0xc4] sm:$0xf0]  ;;  %v706_v62 = vld [vmem:[#allocation8 + $0x58] sm:$0xf0]  ;;  %v697_v63 = vor.u32 %v871_v56, %v696_v55 }
  0x23   :  { %160 = vmatpush.bf16.msra.mxu0 %v631_v39  ;;  %v888_v0 = vld [vmem:[#allocation8 + $0xd4] sm:$0xf]  ;;  %v770_v1 = vld [vmem:[#allocation8 + $0xd8] sm:$0xf0]  ;;  %v761_v2 = vor.u32 %v887_v58, %v760_v57  ;;  %v709_v3 = vor.u32 %v872_v61, %v706_v62  ;;  %v870_v5 = vld [vmem:[#allocation8 + $0x44] sm:$0xf] }
  0x24   :  { %174 = vmatpush.bf16.msra.mxu1 %v635_v43  ;;  %387 = vmatpush.bf16.msra.mxu2 %v705_v51  ;;  %v773_v4 = vor.u32 %v888_v0, %v770_v1  ;;  %v698_v6 = vld [vmem:[#allocation8 + $0x48] sm:$0xf0]  ;;  %v886_v7 = vld [vmem:[#allocation8 + $0xc4] sm:$0xf]  ;;  %v688_v11 = vld [vmem:[#allocation8 + $0x30] sm:$0xf] }
  0x25   :  { %401 = vmatpush.bf16.msra.mxu3 %v769_v54  ;;  %v762_v8 = vld [vmem:[#allocation8 + $0xc8] sm:$0xf0]  ;;  %v701_v9 = vor.u32 %v870_v5, %v698_v6  ;;  %v869_v12 = vld [vmem:[#allocation8 + $0x34] sm:$0xf0]  ;;  %v752_v13 = vld [vmem:[#allocation8 + $0xb0] sm:$0xf] }
  0x26   :  { %660 = vmatmul.msk.bf16.vlgmr.msra.gmra.mxu0 %vm149_vm0, %v94_v52  ;;  %v765_v10 = vor.u32 %v886_v7, %v762_v8  ;;  %v689_v14 = vor.u32 %v869_v12, %v688_v11  ;;  %v885_v15 = vld [vmem:[#allocation8 + $0xb4] sm:$0xf0]  ;;  %v868_v16 = vld [vmem:[#allocation8 + $0x34] sm:$0xf]  ;;  %v690_v17 = vld [vmem:[#allocation8 + $0x38] sm:$0xf0] }
  0x27   :  { %413 = vmatpush.bf16.msrb.mxu0 %v725_v44  ;;  %661 = vmatmul.msk.bf16.vlgmr.msra.gmra.mxu1 %vm149_vm0, %v94_v52  ;;  %v753_v18 = vor.u32 %v885_v15, %v752_v13  ;;  %v693_v19 = vor.u32 %v868_v16, %v690_v17  ;;  %v884_v20 = vld [vmem:[#allocation8 + $0xb4] sm:$0xf]  ;;  %v754_v21 = vld [vmem:[#allocation8 + $0xb8] sm:$0xf0]  ;;  %v680_v23 = vld [vmem:[#allocation8 + $0x20] sm:$0xf] }
  0x28   :  { %427 = vmatpush.bf16.msrb.mxu1 %v789_v47  ;;  %388 = vmatpush.bf16.msra.mxu2 %v697_v63  ;;  %v757_v22 = vor.u32 %v884_v20, %v754_v21  ;;  %v867_v24 = vld [vmem:[#allocation8 + $0x24] sm:$0xf0]  ;;  %v744_v26 = vld [vmem:[#allocation8 + $0xa0] sm:$0xf]  ;;  %v866_v28 = vld [vmem:[#allocation8 + $0x24] sm:$0xf] }
  0x29   :  { %402 = vmatpush.bf16.msra.mxu3 %v761_v2  ;;  %v681_v25 = vor.u32 %v867_v24, %v680_v23  ;;  %v883_v27 = vld [vmem:[#allocation8 + $0xa4] sm:$0xf0]  ;;  %v682_v30 = vld [vmem:[#allocation8 + $0x28] sm:$0xf0]  ;;  %v882_v31 = vld [vmem:[#allocation8 + $0xa4] sm:$0xf] }
  0x2a   :  { %v745_v29 = vor.u32 %v883_v27, %v744_v26  ;;  %v746_v32 = vld [vmem:[#allocation8 + $0xa8] sm:$0xf0]  ;;  %v685_v33 = vor.u32 %v866_v28, %v682_v30  ;;  %v672_v35 = vld [vmem:[#allocation8 + $0x10] sm:$0xf]  ;;  %v865_v36 = vld [vmem:[#allocation8 + $0x14] sm:$0xf0] }
  0x2b   :  { %414 = vmatpush.bf16.msrb.mxu0 %v717_v59  ;;  %v749_v34 = vor.u32 %v882_v31, %v746_v32  ;;  %v736_v37 = vld [vmem:[#allocation8 + $0x90] sm:$0xf]  ;;  %v673_v38 = vor.u32 %v865_v36, %v672_v35  ;;  %v881_v39 = vld [vmem:[#allocation8 + $0x94] sm:$0xf0]  ;;  %v864_v40 = vld [vmem:[#allocation8 + $0x14] sm:$0xf] }
  0x2c   :  { %428 = vmatpush.bf16.msrb.mxu1 %v781_v60  ;;  %389 = vmatpush.bf16.msra.mxu2 %v689_v14  ;;  %v674_v41 = vld [vmem:[#allocation8 + $0x18] sm:$0xf0]  ;;  %v737_v42 = vor.u32 %v881_v39, %v736_v37  ;;  %v880_v44 = vld [vmem:[#allocation8 + $0x94] sm:$0xf]  ;;  %v664_v47 = vld [vmem:[#allocation8] sm:$0xf] }
  0x2d   :  { %403 = vmatpush.bf16.msra.mxu3 %v753_v18  ;;  %v677_v43 = vor.u32 %v864_v40, %v674_v41  ;;  %v738_v45 = vld [vmem:[#allocation8 + $0x98] sm:$0xf0]  ;;  %v863_v48 = vld [vmem:[#allocation8 + $0x4] sm:$0xf0]  ;;  %v728_v49 = vld [vmem:[#allocation8 + $0x80] sm:$0xf] }
  0x2e   :  { %v741_v46 = vor.u32 %v880_v44, %v738_v45  ;;  %v665_v50 = vor.u32 %v863_v48, %v664_v47  ;;  %v879_v51 = vld [vmem:[#allocation8 + $0x84] sm:$0xf0]  ;;  %v862_v52 = vld [vmem:[#allocation8 + $0x4] sm:$0xf]  ;;  %v666_v53 = vld [vmem:[#allocation8 + $0x8] sm:$0xf0] }
  0x2f   :  { %415 = vmatpush.bf16.msrb.mxu0 %v709_v3  ;;  %v729_v54 = vor.u32 %v879_v51, %v728_v49  ;;  %v669_v55 = vor.u32 %v862_v52, %v666_v53  ;;  %v878_v56 = vld [vmem:[#allocation8 + $0x84] sm:$0xf]  ;;  %v730_v57 = vld [vmem:[#allocation8 + $0x88] sm:$0xf0]  ;;  %v909_v59 = vld [vmem:[#allocation9 + $0x78] sm:$0xff]  ;;  %v480_v53 = vstv %s1140_s6  ;;  %s611_s26 = sshll.u32 %s1055_s25, 4  ;;  %s612_s26 = int_to_ptr.vmem [resolvable:$true] %s611_s26 }
  0x30   :  { %429 = vmatpush.bf16.msrb.mxu1 %v773_v4  ;;  %390 = vmatpush.bf16.msra.mxu2 %v681_v25  ;;  %v733_v58 = vor.u32 %v878_v56, %v730_v57  ;;  %v901_v60 = vld [vmem:[#allocation9 + $0x38] sm:$0xff]  ;;  %v908_v61 = vld [vmem:[#allocation9 + $0x70] sm:$0xff]  ;;  %v907_v63 = vld [vmem:[#allocation9 + $0x68] sm:$0xff]  ;;  %s613_s29 = sshll.u32 %s1141_s7, 4  ;;  %s614_s29 = int_to_ptr.hbm [resolvable:$true] %s613_s29 }
  0x31   :  { %404 = vmatpush.bf16.msra.mxu3 %v745_v29  ;;  %v900_v62 = vld [vmem:[#allocation9 + $0x30] sm:$0xff]  ;;  %v906_v0 = vld [vmem:[#allocation9 + $0x60] sm:$0xff]  ;;  %v899_v18 = vld [vmem:[#allocation9 + $0x28] sm:$0xff] }
  0x32   :  { %v103_v1 = vld [vmem:[%s1136_s2] sm:$0x3]  ;;  %v898_v20 = vld [vmem:[#allocation9 + $0x20] sm:$0xff]  ;;  %v903_v23 = vld [vmem:[#allocation9 + $0x48] sm:$0xff] }
  0x33   :  { %416 = vmatpush.bf16.msrb.mxu0 %v701_v9  ;;  %v105_v4 = vperm.slane %v103_v1, 0  ;;  %v106_v5 = vperm.slane %v103_v1, 1  ;;  %v904_v21 = vld [vmem:[#allocation9 + $0x50] sm:$0xff]  ;;  %v902_v25 = vld [vmem:[#allocation9 + $0x40] sm:$0xff]  ;;  %v895_v26 = vld [vmem:[#allocation9 + $0x8] sm:$0xff] }
  0x34   :  { %430 = vmatpush.bf16.msrb.mxu1 %v765_v10  ;;  %391 = vmatpush.bf16.msra.mxu2 %v673_v38  ;;  %v896_v24 = vld [vmem:[#allocation9 + $0x10] sm:$0xff]  ;;  %v894_v27 = vld [vmem:[#allocation9] sm:$0xff] }
  0x35   :  { %405 = vmatpush.bf16.msra.mxu3 %v737_v42  ;;  %v219_v28 = vld [vmem:[%s1138_s4] sm:$0x3] }
  0x36   :  { %v222_v30 = vperm.slane %v219_v28, 1 }
  0x37   :  { %417 = vmatpush.bf16.msrb.mxu0 %v693_v19  ;;  %v905_v19 = vld [vmem:[#allocation9 + $0x58] sm:$0xff] }
  0x38   :  { %431 = vmatpush.bf16.msrb.mxu1 %v757_v22  ;;  %392 = vmatpush.bf16.msra.mxu2 %v665_v50  ;;  %v897_v22 = vld [vmem:[#allocation9 + $0x18] sm:$0xff] }
  0x39   :  { %406 = vmatpush.bf16.msra.mxu3 %v729_v54 }
  0x3b   :  { %418 = vmatpush.bf16.msrb.mxu0 %v685_v33 }
  0x3c   :  { %432 = vmatpush.bf16.msrb.mxu1 %v749_v34  ;;  %577 = vmatpush.bf16.msrb.mxu2 %v901_v60  ;;  %v221_v34 = vperm.slane %v219_v28, 0 }
  0x3d   :  { %591 = vmatpush.bf16.msrb.mxu3 %v909_v59 }
  0x3f   :  { %419 = vmatpush.bf16.msrb.mxu0 %v677_v43 }
  0x40   :  { %433 = vmatpush.bf16.msrb.mxu1 %v741_v46  ;;  %578 = vmatpush.bf16.msrb.mxu2 %v900_v62 }
  0x41   :  { %592 = vmatpush.bf16.msrb.mxu3 %v908_v61 }
  0x43   :  { %420 = vmatpush.bf16.msrb.mxu0 %v669_v55 }
  0x44   :  { %434 = vmatpush.bf16.msrb.mxu1 %v733_v58  ;;  %579 = vmatpush.bf16.msrb.mxu2 %v899_v18 }
  0x45   :  { %593 = vmatpush.bf16.msrb.mxu3 %v907_v63 }
  0x48   :  { %580 = vmatpush.bf16.msrb.mxu2 %v898_v20 }
  0x49   :  { %594 = vmatpush.bf16.msrb.mxu3 %v906_v0 }
  0x4c   :  { %581 = vmatpush.bf16.msrb.mxu2 %v897_v22 }
  0x4d   :  { %595 = vmatpush.bf16.msrb.mxu3 %v905_v19 }
  0x50   :  { %582 = vmatpush.bf16.msrb.mxu2 %v896_v24 }
  0x51   :  { %596 = vmatpush.bf16.msrb.mxu3 %v904_v21 }
  0x54   :  { %583 = vmatpush.bf16.msrb.mxu2 %v895_v26 }
  0x55   :  { %597 = vmatpush.bf16.msrb.mxu3 %v903_v23 }
  0x58   :  { %584 = vmatpush.bf16.msrb.mxu2 %v894_v27 }
  0x59   :  { %598 = vmatpush.bf16.msrb.mxu3 %v902_v25 }
  0xa3   :  { %v162_v2 = vpop.f32.mrf.mxu0 }
  0xa4   :  { %v176_v3 = vpop.f32.mrf.mxu1  ;;  %v163_v6 = vadd.f32 %v162_v2, %v105_v4 }
  0xa5   :  { %v177_v7 = vadd.f32 %v176_v3, %v106_v5 }
  0xa6   :  { %v181_v12 = vmax.f32 %v163_v6, 0.0 }
  0xa7   :  { %v182_v14 = vmax.f32 %v177_v7, 0.0 }
  0xab   :  { %v164_v8 = vpop.f32.mrf.mxu0 }
  0xac   :  { %v165_v9 = vadd.f32 %v164_v8, %v105_v4  ;;  %v178_v10 = vpop.f32.mrf.mxu1 }
  0xad   :  { %v179_v11 = vadd.f32 %v178_v10, %v106_v5 }
  0xae   :  { %v183_v13 = vmax.f32 %v165_v9, 0.0 }
  0xaf   :  { %v184_v15 = vmax.f32 %v179_v11, 0.0 }
  0xb0   :  { %v185_v16 = vpack.c.bf16 %v183_v13, %v181_v12 }
  0xb1   :  { %v186_v17 = vpack.c.bf16 %v184_v15, %v182_v14 }
  0xb2   :  { %393 = vmatmul.bf16.vlgmr.msra.gmra.mxu2 %v185_v16  ;;  %421 = vmatmul.bf16.vlgmr.msrb.gmra.mxu0 %v185_v16 }
  0xb3   :  { %407 = vmatmul.bf16.vlgmr.msra.gmra.mxu3 %v186_v17  ;;  %435 = vmatmul.bf16.vlgmr.msrb.gmra.mxu1 %v186_v17 }
 0x12f   :  { %v422_v29 = vpop.f32.mrf.mxu0 }
 0x130   :  { %v436_v31 = vpop.f32.mrf.mxu1  ;;  %v423_v32 = vadd.f32 %v422_v29, %v222_v30 }
 0x132   :  { %v437_v37 = vadd.f32 %v436_v31, %v423_v32 }
 0x134   :  { %v442_v42 = vmax.f32 %v437_v37, 0.0 }
 0x135   :  { %v394_v33 = vpop.f32.mrf.mxu2 }
 0x136   :  { %v408_v35 = vpop.f32.mrf.mxu3  ;;  %v395_v40 = vadd.f32 %v394_v33, %v221_v34 }
 0x137   :  { %v424_v36 = vpop.f32.mrf.mxu0 }
 0x138   :  { %v425_v38 = vadd.f32 %v424_v36, %v222_v30  ;;  %v438_v39 = vpop.f32.mrf.mxu1  ;;  %v409_v45 = vadd.f32 %v408_v35, %v395_v40 }
 0x13a   :  { %v439_v41 = vadd.f32 %v438_v39, %v425_v38  ;;  %v441_v50 = vmax.f32 %v409_v45, 0.0 }
 0x13c   :  { %v444_v43 = vmax.f32 %v439_v41, 0.0 }
 0x13d   :  { %v396_v44 = vpop.f32.mrf.mxu2 }
 0x13e   :  { %v446_v46 = vpack.c.bf16 %v444_v43, %v442_v42  ;;  %v397_v47 = vadd.f32 %v396_v44, %v221_v34  ;;  %v410_v48 = vpop.f32.mrf.mxu3 }
 0x140   :  { %v411_v49 = vadd.f32 %v410_v48, %v397_v47  ;;  %599 = vmatmul.bf16.vlgmr.msrb.gmra.mxu3 %v446_v46 }
 0x142   :  { %v443_v51 = vmax.f32 %v411_v49, 0.0 }
 0x144   :  { %v445_v52 = vpack.c.bf16 %v443_v51, %v441_v50 }
 0x146   :  { %585 = vmatmul.bf16.vlgmr.msrb.gmra.mxu2 %v445_v52 }
 0x1c3   :  { %v600_v54 = vpop.f32.mrf.mxu3 }
 0x1c9   :  { %v586_v55 = vpop.f32.mrf.mxu2 }
 0x1ca   :  { %v587_v56 = vadd.f32 %v586_v55, %v480_v53 }
 0x1cb   :  { %v602_v60 = vpop.f32.mrf.mxu3 }
 0x1cc   :  { %v601_v57 = vadd.f32 %v600_v54, %v587_v56 }
 0x1ce   :  { %605 = vst [vmem:[#allocation11] sm:$0xff] %v601_v57 }
 0x1d1   :  { %v588_v58 = vpop.f32.mrf.mxu2 }
 0x1d2   :  { %v589_v59 = vadd.f32 %v588_v58, %v480_v53 }
 0x1d4   :  { %v603_v61 = vadd.f32 %v602_v60, %v589_v59 }
 0x1d6   :  { %606 = vst [vmem:[#allocation11 + $0x8] sm:$0xff] %v603_v61 }
 0x1d7   :  { %619 = dma.vmem_to_hbm [thread:$0]  %s612_s26, 256, %s614_s29, [#allocation5], %s1048_s9, %s1048_s9, %s1049_s10  }
 0x1d8   :  { %1045 = dma.done.wait [#allocation5], 256  }
 0x1d9   :  { %1046 = vsyncadd [#allocation5], 4294967040 }
 0x1da   :  { %624 = vsyncpa [#allocation4], 1 }
 0x1db   :  { %625 = vsyncpa [#allocation7], 1 }
 0x1dc   :  { %626 = vsyncpa [#allocation10], 1 }
 0x1dd   :  { %627 = vsyncpa [#allocation5], 1 }

</bundles_post_ra>
